<compile_context>
chip_gen: v5e
topology: v5e:2x2
jax: 0.10.0
libtpu: 0.0.40
codegen_flags: <defaults>
</compile_context>

<pallas_src>
import math
import functools

import numpy as np
import jax
import jax.numpy as jnp
from jax.experimental import pallas as pl
from jax.experimental.pallas import tpu as pltpu


_VMEM_BUDGET = 24 << 20   # resident (double-buffered) block budget, < 32 MiB scoped limit


def _build_pe_table(d_model: int, max_seq_len: int) -> jnp.ndarray:
    """Reproduce the (quirky) PyTorch init loop exactly, vectorized in f64.

    pe[pos, i]   = sin(pos / 10000 ** (2 * i       / d_model))   for even i
    pe[pos, i+1] = cos(pos / 10000 ** (2 * (i + 1) / d_model))
    (Note: exponent 2*(i+1)/d_model for cosine is intentional -- it matches the
    PyTorch module, not the canonical Vaswani et al. table.)
    """
    pos = np.arange(max_seq_len, dtype=np.float64)[:, None]            # (L, 1)
    i_even = np.arange(0, d_model, 2, dtype=np.float64)[None, :]       # (1, D/2)
    pe = np.zeros((max_seq_len, d_model), dtype=np.float64)
    pe[:, 0::2] = np.sin(pos / np.power(10000.0, 2.0 * i_even / d_model))
    pe[:, 1::2] = np.cos(pos / np.power(10000.0, 2.0 * (i_even + 1.0) / d_model))
    return jnp.asarray(pe, dtype=jnp.float32)


def _pe_add_kernel(x_ref, pe_ref, o_ref, *, scale):
    # Blocked path: x_ref/o_ref (tS, D) (batch dim squeezed), pe_ref (tS, D).
    # Flat path:    x_ref/o_ref (tB, tF),                      pe_ref (1, tF)
    #               (broadcast along sublanes).
    # Math is done in x's dtype (exact for f32; tiny delta for bf16 inputs).
    o_ref[...] = (x_ref[...] * scale + pe_ref[...]).astype(o_ref.dtype)


def _choose_seq_tile(S: int, D: int, x_bytes: int, pe_bytes: int, batch: int) -> int:
    """Fixed sequence-tile height: multiple of 8, sized so the double-buffered
    (x, out, pe) resident set stays under _VMEM_BUDGET; capped at 2048 rows
    (blocks are already multi-MB / on the flat part of the HBM roofline)."""
    if S < 8:
        return S                                    # full-dim block (caller slices pe)
    per_row = D * 2 * (2 * x_bytes + pe_bytes)      # 2 x-bufs + 2 out-bufs + 2 pe-bufs
    tS = max(8, min(_VMEM_BUDGET // max(per_row, 1), 2048))
    tS = (tS // 8) * 8
    tS = min(tS, (S // 8) * 8)                      # first block fully in-bounds
    if batch == 1:
        # v7x: keep >= 2 S-tiles when the batch axis has a single step.
        tS = min(tS, max(8, ((S // 2) // 8) * 8))
    return max(tS, 8)


def _choose_flat_tile(F: int, B: int, x_bytes: int, pe_bytes: int):
    """Lane-dense flat tile: multiple of 128 columns, tB = min(B, 8) rows."""
    tB = min(B, 8)
    if F < 128:
        return F, tB                                # full-dim lane block
    per_col = 2 * (2 * tB * x_bytes + pe_bytes)
    tF = max(128, min(_VMEM_BUDGET // max(per_col, 1), 64 * 1024))
    tF = (tF // 128) * 128
    tF = min(tF, (F // 128) * 128)
    return max(tF, 128), tB


def _positional_encoder_blocked(x: jnp.ndarray, pe_full: jnp.ndarray, scale: float) -> jnp.ndarray:
    """d_model a multiple of 128: (tS, D) blocks window pe_full directly (no pe copy)."""
    B, S, D = x.shape
    pe_arg = pe_full if x.dtype == jnp.float32 else pe_full.astype(x.dtype)
    x_bytes = jnp.dtype(x.dtype).itemsize
    pe_bytes = jnp.dtype(pe_arg.dtype).itemsize
    tS = _choose_seq_tile(S, D, x_bytes, pe_bytes, B)
    if S < 8:
        # Block dims must equal full dims when not multiples of 8.
        pe_arg = pe_arg[:S]
    num_s_tiles = pl.cdiv(S, tS)

    kernel = functools.partial(_pe_add_kernel, scale=scale)
    # NOTE: with the cdiv grid the last pe block may cover rows >= S (real rows
    # of pe_full, harmless: the matching output rows are masked) or rows past
    # max_seq_len (Pallas pads OOB input blocks).  Intentional; do not "fix".
    return pl.pallas_call(
        kernel,
        out_shape=jax.ShapeDtypeStruct((B, S, D), x.dtype),
        grid_spec=pltpu.PrefetchScalarGridSpec(
            num_scalar_prefetch=0,
            # S-tile axis OUTER ("parallel"), batch INNER ("arbitrary" ->
            # strictly sequential, so the pe block index is unchanged across
            # consecutive steps and its DMA is skipped: pe reads ~= num_s_tiles).
            grid=(num_s_tiles, B),
            in_specs=[
                pl.BlockSpec((pl.Squeezed(), tS, D), lambda s, b: (b, s, 0)),  # x
                pl.BlockSpec((tS, D), lambda s, b: (s, 0)),                    # pe
            ],
            out_specs=pl.BlockSpec((pl.Squeezed(), tS, D), lambda s, b: (b, s, 0)),
        ),
        compiler_params=pltpu.CompilerParams(
            dimension_semantics=("parallel", "arbitrary"),
            vmem_limit_bytes=32 << 20,
        ),
    )(x, pe_arg)


def _positional_encoder_flat(x: jnp.ndarray, pe_full: jnp.ndarray, scale: float) -> jnp.ndarray:
    """d_model not lane-aligned (e.g. 32): flatten to a lane-dense (B, S*D)
    view tiled in multiples of 128 so output stores are unmasked full-lane vst's."""
    B, S, D = x.shape
    F = S * D
    pe_dtype = jnp.float32 if x.dtype == jnp.float32 else x.dtype
    # Slice + reshape copies S*D elements once; negligible in the small-D regime.
    pe_flat = pe_full[:S].astype(pe_dtype).reshape(1, F)
    x_flat = x.reshape(B, F)
    tF, tB = _choose_flat_tile(F, B, jnp.dtype(x.dtype).itemsize,
                               jnp.dtype(pe_dtype).itemsize)

    kernel = functools.partial(_pe_add_kernel, scale=scale)
    out_flat = pl.pallas_call(
        kernel,
        out_shape=jax.ShapeDtypeStruct((B, F), x.dtype),
        grid_spec=pltpu.PrefetchScalarGridSpec(
            num_scalar_prefetch=0,
            # Flat-tile axis OUTER ("parallel"), batch-tile axis INNER
            # ("arbitrary") so the pe block stays resident across batch steps.
            grid=(pl.cdiv(F, tF), pl.cdiv(B, tB)),
            in_specs=[
                pl.BlockSpec((tB, tF), lambda f, b: (b, f)),   # x (flattened)
                pl.BlockSpec((1, tF), lambda f, b: (0, f)),    # pe (flattened)
            ],
            out_specs=pl.BlockSpec((tB, tF), lambda f, b: (b, f)),
        ),
        compiler_params=pltpu.CompilerParams(
            dimension_semantics=("parallel", "arbitrary"),
            vmem_limit_bytes=32 << 20,
        ),
    )(x_flat, pe_flat)
    return out_flat.reshape(B, S, D)


def positional_encoder_pallas(x: jnp.ndarray, pe_full: jnp.ndarray, d_model: int) -> jnp.ndarray:
    B, S, D = x.shape
    assert D == d_model
    assert S <= pe_full.shape[0], "seq_len exceeds max_seq_len of PE table"
    scale = math.sqrt(d_model)
    if D >= 128 and D % 128 == 0:
        return _positional_encoder_blocked(x, pe_full, scale)
    return _positional_encoder_flat(x, pe_full, scale)


def positional_encoder_ref(x: jnp.ndarray, pe_full: jnp.ndarray, d_model: int) -> jnp.ndarray:
    S = x.shape[1]
    return x * math.sqrt(d_model) + pe_full[None, :S, :]


def positional_encoder(x: jnp.ndarray, pe_full: jnp.ndarray, d_model: int,
                       *, force_pallas: bool = False) -> jnp.ndarray:
    # Tiny inputs: a fused XLA elementwise op beats any hand kernel
    # (launch + ~0.35 us/grid-step overhead vs a few KiB of traffic).
    if not force_pallas and x.size < (1 << 20):
        return positional_encoder_ref(x, pe_full, d_model)
    return positional_encoder_pallas(x, pe_full, d_model)


if __name__ == "__main__":
    # 1) Small-D (lane-dense flattened) path, matching the module defaults.
    d_model = 32
    max_seq_len = 80
    batch, seq = 2, 8

    pe_full = _build_pe_table(d_model, max_seq_len)
    key = jax.random.PRNGKey(0)
    x = jax.random.normal(key, (batch, seq, d_model), dtype=jnp.float32)

    out = positional_encoder(x, pe_full, d_model, force_pallas=True)
    out = jax.block_until_ready(out)
    ref = positional_encoder_ref(x, pe_full, d_model)
    assert out.shape == (batch, seq, d_model)
    assert jnp.allclose(out, ref, atol=1e-5, rtol=1e-5), "flat-path mismatch vs reference"

    # 2) Lane-aligned (d_model % 128 == 0) blocked path, still small.
    d2, s2 = 128, 16
    pe2 = _build_pe_table(d2, max_seq_len)
    x2 = jax.random.normal(jax.random.PRNGKey(0), (batch, s2, d2), dtype=jnp.float32)
    out2 = positional_encoder(x2, pe2, d2, force_pallas=True)
    out2 = jax.block_until_ready(out2)
    ref2 = positional_encoder_ref(x2, pe2, d2)
    assert jnp.allclose(out2, ref2, atol=1e-5, rtol=1e-5), "blocked-path mismatch vs reference"

    print("KERNEL_OK")
</pallas_src>

<mosaic_0001>
module attributes {stable_mosaic.version = 11 : i64} {
  func.func @_pe_add_kernel(%arg0: i32, %arg1: i32, %arg2: memref<2x256xf32, #tpu.memory_space<vmem>>, %arg3: memref<1x256xf32, #tpu.memory_space<vmem>>, %arg4: memref<2x256xf32, #tpu.memory_space<vmem>>) attributes {dimension_semantics = [#tpu.dimension_semantics<parallel>, #tpu.dimension_semantics<arbitrary>], iteration_bounds = array<i64: 1, 1>, scalar_prefetch = 0 : i64, scratch_operands = 0 : i64, tpu.core_type = #tpu.core_type<tc>, window_params = [{transform_indices = @transform_0, window_bounds = array<i64: 2, 256>}, {transform_indices = @transform_1, window_bounds = array<i64: 1, 256>}, {transform_indices = @transform_2, window_bounds = array<i64: 2, 256>}]} {
    %c0 = arith.constant 0 : index
    %c0_0 = arith.constant 0 : index
    %0 = vector.load %arg2[%c0, %c0_0] : memref<2x256xf32, #tpu.memory_space<vmem>>, vector<2x256xf32>
    %cst = arith.constant 5.65685415 : f32
    %1 = vector.broadcast %cst : f32 to vector<2x256xf32>
    %2 = arith.mulf %0, %1 : vector<2x256xf32>
    %c0_1 = arith.constant 0 : index
    %c0_2 = arith.constant 0 : index
    %3 = vector.load %arg3[%c0_1, %c0_2] : memref<1x256xf32, #tpu.memory_space<vmem>>, vector<1x256xf32>
    %4 = vector.broadcast %3 : vector<1x256xf32> to vector<2x256xf32>
    %5 = arith.addf %2, %4 : vector<2x256xf32>
    %c0_3 = arith.constant 0 : index
    %c0_4 = arith.constant 0 : index
    %6 = vector.load %arg4[%c0_3, %c0_4] : memref<2x256xf32, #tpu.memory_space<vmem>>, vector<2x256xf32>
    tpu.vector_store %arg4[%c0_3, %c0_4], %5 {strides = array<i32>} : memref<2x256xf32, #tpu.memory_space<vmem>>, vector<2x256xf32>,
    return
  }
  func.func @transform_0(%arg0: i32, %arg1: i32) -> (i32, i32) {
    %c0_i32 = arith.constant 0 : i32
    return %arg1, %arg0 : i32, i32
  }
  func.func @transform_1(%arg0: i32, %arg1: i32) -> (i32, i32) {
    %c0_i32 = arith.constant 0 : i32
    %c0_i32_0 = arith.constant 0 : i32
    return %c0_i32, %arg0 : i32, i32
  }
  func.func @transform_2(%arg0: i32, %arg1: i32) -> (i32, i32) {
    %c0_i32 = arith.constant 0 : i32
    return %arg1, %arg0 : i32, i32
  }
}

</mosaic_0001>

<bundles_post_ra>
// kernel: tpu_custom_call.1
= control target key start
LH: loop header
LB: loop body
LE: loop exit
PB: predicated region body
PF: predicated region fallthrough
CT: control target
= control target key end

     0   :  { %7 = vsyncpa [#allocation3], 0  ;;  %s178_s0 = inlined_call_operand.hbm [shape: f32[2,256], index: 0, kind: input, shape index: {}]   ;;  %s179_s1 = inlined_call_operand.hbm [shape: f32[1,256], index: 1, kind: input, shape index: {}]   ;;  %s180_s2 = inlined_call_operand.hbm [shape: f32[2,256], index: 2, kind: output, shape index: {}]  }
   0x1   :  { %8 = vsyncpa [#allocation6], 0 }
   0x2   :  { %9 = vsyncpa [#allocation4], 0  ;;  %s15_s11 = sshll.u32 %s178_s0, 4  ;;  %s151_s12 = smov [#allocation2]   ;;  %s16_s11 = int_to_ptr.hbm [resolvable:$true] %s15_s11 }
   0x3   :  { %s17_s13 = sshll.u32 %s151_s12, 4  ;;  %s26_s16 = sshll.u32 %s179_s1, 4  ;;  %s18_s13 = int_to_ptr.vmem [resolvable:$true] %s17_s13  ;;  %s27_s16 = int_to_ptr.hbm [resolvable:$true] %s26_s16 }
   0x4   :  { %20 = dma.hbm_to_vmem [thread:$0]  %s16_s11, 64, %s18_s13, [#allocation3]  }
   0x5   :  { %s152_s17 = smov [#allocation5]  }
   0x6   :  { %s28_s18 = sshll.u32 %s152_s17, 4  ;;  %s29_s18 = int_to_ptr.vmem [resolvable:$true] %s28_s18 }
   0x7   :  { %31 = dma.hbm_to_vmem [thread:$0]  %s27_s16, 32, %s29_s18, [#allocation6]  }
   0x8   :  { %145 = dma.done.wait [#allocation3], 64  }
   0x9   :  { %146 = vsyncadd [#allocation3], 4294967232 }
   0xa   :  { %147 = dma.done.wait [#allocation6], 32  }
   0xb   :  { %148 = vsyncadd [#allocation6], 4294967264  ;;  %v40_v0 = vld [vmem:[#allocation2] sm:$0xf]  ;;  %v42_v1 = vld [vmem:[#allocation5] sm:$0x3] }
   0xc   :  { %v44_v2 = vperm.slane %v42_v1, 0  ;;  %v45_v3 = vperm.slane %v42_v1, 1  ;;  %v41_v4 = vmul.f32 5.656854, %v40_v0  ;;  %vm47_vm0 = vcmask 1041408   ;;  %s153_s0 = smov [#allocation7]  }
   0xd   :  { %s57_s19 = sshll.u32 %s153_s0, 4  ;;  %s59_s21 = sshll.u32 %s180_s2, 4  ;;  %s58_s19 = int_to_ptr.vmem [resolvable:$true] %s57_s19  ;;  %s60_s21 = int_to_ptr.hbm [resolvable:$true] %s59_s21 }
   0xe   :  { %v46_v5 = vrot.slane %v45_v3, 6 }
  0x10   :  { %v48_v6 = vsel %vm47_vm0, %v44_v2, %v46_v5 }
  0x11   :  { %v50_v7 = vadd.f32 %v48_v6, %v41_v4 }
  0x13   :  { %51 = vst [vmem:[#allocation7] sm:$0xf] %v50_v7 }
  0x14   :  { %62 = dma.vmem_to_hbm [thread:$0]  %s58_s19, 64, %s60_s21, [#allocation4]  }
  0x15   :  { %149 = dma.done.wait [#allocation4], 64  }
  0x16   :  { %150 = vsyncadd [#allocation4], 4294967232 }
  0x17   :  { %67 = vsyncpa [#allocation3], 1 }
  0x18   :  { %68 = vsyncpa [#allocation6], 1 }
  0x19   :  { %69 = vsyncpa [#allocation4], 1 }

</bundles_post_ra>
